<compile_context>
chip_gen: v7x
topology: tpu7x:2x2x1
jax: 0.10.0
libtpu: 0.0.40
codegen_flags: <defaults>
</compile_context>

<pallas_src>
import functools

import jax
import jax.numpy as jnp
from jax.experimental import pallas as pl
from jax.experimental.pallas import tpu as pltpu

LANE = 128
MAX_ROW_TILE = 8192      # 8192*128 elems: 4 MiB f32 + 1 MiB int8 per block


def _num_shards():
    """TensorCores to split the row stream across (2 on v7x, else 1).

    Falls back to 2, which is harmless on single-core chips (one extra
    clamped, fully-masked block plus a second tiny finalize)."""
    try:
        info = pltpu.get_tpu_info()
        for name in ("num_tensorcores", "tensorcore_count", "num_cores",
                     "core_count"):
            v = getattr(info, name, None)
            if isinstance(v, int) and 1 <= v <= 16:
                return min(v, 2)   # only the 1-vs-2 distinction matters here
    except Exception:
        pass
    return 2


def _seeding_loss_kernel(sm_ref, cues_ref, num_ref, den_ref,
                         num_acc, den_acc, *, steps, row_tile, valid_rows):
    s = pl.program_id(0)          # shard (parallel across TensorCores)
    k = pl.program_id(1)          # sequential step within a shard

    @pl.when(k == 0)
    def _():
        num_acc[...] = jnp.zeros_like(num_acc)
        den_acc[...] = jnp.zeros_like(den_acc)

    blk = s * steps + k
    # Scalar predicate: every row of this block lies inside the array.  True
    # for all steady-state blocks; false only for the single ragged tail
    # block and the clamped duplicate blocks assigned past the end.
    full_block = (blk + 1) * row_tile <= valid_rows

    def _accumulate(sm, cues):
        # vreg-shaped partial sums: pure VPU adds, no per-step cross-lane
        # reduce (row_tile is a multiple of 8 by construction).
        num_acc[...] += (cues * jnp.log(sm)).reshape(-1, 8, LANE).sum(axis=0)
        den_acc[...] += cues.reshape(-1, 8, LANE).sum(axis=0)

    @pl.when(full_block)
    def _():
        # Fast path: no iota / compare / select.  Lane-pad tail elements are
        # (sm=1, cues=0) so they contribute exactly 0 to both sums.
        _accumulate(sm_ref[...], cues_ref[...].astype(jnp.float32))

    @pl.when(jnp.logical_not(full_block))
    def _():
        # Tail / duplicate path: mask rows that fall outside the array
        # (row-only compare; out-of-range edge-block reads hold junk data).
        row = jax.lax.broadcasted_iota(jnp.int32, (row_tile, LANE), 0)
        valid = (blk * row_tile + row) < valid_rows
        sm = jnp.where(valid, sm_ref[...], 1.0)                      # log(1)=0
        cues = jnp.where(valid, cues_ref[...].astype(jnp.float32), 0.0)
        _accumulate(sm, cues)

    @pl.when(k == steps - 1)
    def _():
        num_ref[...] = jnp.sum(num_acc[...]).reshape(1, 1, 1)
        den_ref[...] = jnp.sum(den_acc[...]).reshape(1, 1, 1)


def seeding_loss(sm_mask, cues, flag_use_cuda=False):
    """sm_mask: (B, C, H, W) softmax probabilities (NCHW).
       cues:    (B, C, Hc, Wc) localization cues (NCHW).
       flag_use_cuda is a device-placement flag in the original module; it is
       a no-op here (JAX manages device placement)."""
    del flag_use_cuda
    B, C, H, W = sm_mask.shape

    # --- glue: resize cues to sm_mask spatial size + round -----------------
    # TODO(synk): skimage.transform.resize applies Gaussian anti-aliasing when
    # downsampling; plain bilinear resize followed by round is used here.
    cues_r = jax.image.resize(cues.astype(jnp.float32), (B, C, H, W),
                              method="linear")
    # Rounded localization cues are small non-negative integers (binary cues
    # stay in [0,1] under bilinear interpolation) -> exact in int8, which
    # shrinks the second HBM stream to 1 B/elem.  Clip is a cheap safety net
    # for exotic cue values.
    cues_r = jnp.clip(jnp.round(cues_r), 0.0, 127.0).astype(jnp.int8)

    # --- lane-dense 2D view -------------------------------------------------
    total = B * C * H * W
    n_rows = pl.cdiv(total, LANE)
    rows = max(n_rows, 32)                # at least one 32-row int8 tile
    pad_elems = rows * LANE - total

    sm_flat = sm_mask.reshape(-1).astype(jnp.float32)
    cues_flat = cues_r.reshape(-1)
    if pad_elems > 0:
        # TODO(synk): this pad copies the inputs; only hit when total is not
        # a multiple of 128 or the input is tiny.  Pad values chosen so the
        # tail contributes exactly 0 even on the unmasked fast path.
        sm_flat = jnp.pad(sm_flat, (0, pad_elems), constant_values=1.0)
        cues_flat = jnp.pad(cues_flat, (0, pad_elems), constant_values=0)
    sm2d = sm_flat.reshape(rows, LANE)
    cues2d = cues_flat.reshape(rows, LANE)

    # --- tiling --------------------------------------------------------------
    # row_tile: multiple of 32 (int8 sublane packing), up to 8192 rows.  The
    # ragged row tail (if any) is handled by the in-kernel masked path.
    row_tile = min(MAX_ROW_TILE, (rows // 32) * 32)
    n_blocks = pl.cdiv(rows, row_tile)
    num_shards = _num_shards()
    steps = pl.cdiv(n_blocks, num_shards)   # sequential steps per shard

    def in_index(s, k):
        # Shards may be assigned past-the-end blocks; clamp so the DMA stays
        # in-bounds (those blocks take the fully-masked path in-kernel).
        return (jnp.minimum(s * steps + k, n_blocks - 1), 0)

    kernel = functools.partial(_seeding_loss_kernel, steps=steps,
                               row_tile=row_tile, valid_rows=rows)

    num, den = pl.pallas_call(
        kernel,
        out_shape=(
            jax.ShapeDtypeStruct((num_shards, 1, 1), jnp.float32),
            jax.ShapeDtypeStruct((num_shards, 1, 1), jnp.float32),
        ),
        grid_spec=pltpu.PrefetchScalarGridSpec(
            num_scalar_prefetch=0,
            grid=(num_shards, steps),
            in_specs=[
                pl.BlockSpec((row_tile, LANE), in_index),   # sm_mask  (f32)
                pl.BlockSpec((row_tile, LANE), in_index),   # cues     (int8)
            ],
            out_specs=[
                pl.BlockSpec((1, 1, 1), lambda s, k: (s, 0, 0)),
                pl.BlockSpec((1, 1, 1), lambda s, k: (s, 0, 0)),
            ],
            scratch_shapes=[
                pltpu.VMEM((8, LANE), jnp.float32),   # numerator partials
                pltpu.VMEM((8, LANE), jnp.float32),   # denominator partials
            ],
        ),
        compiler_params=pltpu.CompilerParams(
            dimension_semantics=("parallel", "arbitrary"),
            # 2 inputs x 2 pipeline buffers at the 8192-row tile ~= 10 MiB;
            # 32 MiB covers this with headroom on every generation (a raise
            # over v5e's 16 MiB scoped default, a no-op on v6e/v7x).
            vmem_limit_bytes=32 * 1024 * 1024,
        ),
        cost_estimate=pl.CostEstimate(
            flops=3 * total,                             # mul + 2 accumulates
            transcendentals=total,                       # log per element
            bytes_accessed=5 * total + 8 * num_shards,   # f32 sm + int8 cues
        ),
    )(sm2d, cues2d)

    # combine the per-TensorCore partials in the wrapper
    # (division by zero when cues sum to 0 matches the reference module).
    return -jnp.sum(num) / jnp.sum(den)


def _reference(sm_mask, cues):
    B, C, H, W = sm_mask.shape
    cues_r = jnp.round(
        jax.image.resize(cues.astype(jnp.float32), (B, C, H, W), method="linear")
    )
    count = cues_r.sum()
    return -(cues_r * jnp.log(sm_mask)).sum() / count


if __name__ == "__main__":
    key = jax.random.PRNGKey(0)
    k1, k2 = jax.random.split(key)

    B, C, H, W = 2, 4, 16, 16   # sm_mask spatial size
    Hc, Wc = 8, 8               # cues at a coarser resolution

    # sm_mask: softmax over channel dim -> strictly positive probabilities
    logits = jax.random.normal(k1, (B, C, H, W), dtype=jnp.float32)
    sm_mask = jax.nn.softmax(logits, axis=1)

    # cues: sparse binary-ish localization cues
    cues = (jax.random.uniform(k2, (B, C, Hc, Wc)) > 0.7).astype(jnp.float32)

    loss = seeding_loss(sm_mask, cues, flag_use_cuda=False)
    loss = jax.block_until_ready(loss)

    ref = _reference(sm_mask, cues)
    assert jnp.allclose(loss, ref, rtol=1e-5, atol=1e-5), (loss, ref)

    print("KERNEL_OK")
</pallas_src>

<mosaic_0001>
module attributes {stable_mosaic.version = 11 : i64} {
  func.func @_seeding_loss_kernel(%arg0: i32, %arg1: i32, %arg2: memref<32x128xf32, #tpu.memory_space<vmem>>, %arg3: memref<32x128xi8, #tpu.memory_space<vmem>>, %arg4: memref<1x1x1xf32, #tpu.memory_space<vmem>>, %arg5: memref<1x1x1xf32, #tpu.memory_space<vmem>>, %arg6: memref<8x128xf32, #tpu.memory_space<vmem>>, %arg7: memref<8x128xf32, #tpu.memory_space<vmem>>) attributes {dimension_semantics = [#tpu.dimension_semantics<parallel>, #tpu.dimension_semantics<arbitrary>], iteration_bounds = array<i64: 2, 1>, scalar_prefetch = 0 : i64, scratch_operands = 2 : i64, tpu.core_type = #tpu.core_type<tc>, window_params = [{transform_indices = @transform_0, window_bounds = array<i64: 32, 128>}, {transform_indices = @transform_1, window_bounds = array<i64: 32, 128>}, {transform_indices = @transform_2, window_bounds = array<i64: 1, 1, 1>}, {transform_indices = @transform_3, window_bounds = array<i64: 1, 1, 1>}]} {
    %c0_i32 = arith.constant 0 : i32
    %0 = arith.cmpi eq, %arg1, %c0_i32 : i32
    %1 = arith.extui %0 : i1 to i32
    %c0_i32_0 = arith.constant 0 : i32
    %2 = arith.cmpi ne, %1, %c0_i32_0 : i32
    scf.if %2 {
      %cst = arith.constant 0.000000e+00 : f32
      %16 = vector.broadcast %cst : f32 to vector<8x128xf32>
      %c0 = arith.constant 0 : index
      %c0_7 = arith.constant 0 : index
      %17 = vector.load %arg6[%c0, %c0_7] : memref<8x128xf32, #tpu.memory_space<vmem>>, vector<8x128xf32>
      tpu.vector_store %arg6[%c0, %c0_7], %16 {strides = array<i32>} : memref<8x128xf32, #tpu.memory_space<vmem>>, vector<8x128xf32>,
      %cst_8 = arith.constant 0.000000e+00 : f32
      %18 = vector.broadcast %cst_8 : f32 to vector<8x128xf32>
      %c0_9 = arith.constant 0 : index
      %c0_10 = arith.constant 0 : index
      %19 = vector.load %arg7[%c0_9, %c0_10] : memref<8x128xf32, #tpu.memory_space<vmem>>, vector<8x128xf32>
      tpu.vector_store %arg7[%c0_9, %c0_10], %18 {strides = array<i32>} : memref<8x128xf32, #tpu.memory_space<vmem>>, vector<8x128xf32>,
    } else {
    }
    %c1_i32 = arith.constant 1 : i32
    %3 = arith.muli %arg0, %c1_i32 : i32
    %4 = arith.addi %3, %arg1 : i32
    %c1_i32_1 = arith.constant 1 : i32
    %5 = arith.addi %4, %c1_i32_1 : i32
    %c32_i32 = arith.constant 32 : i32
    %6 = arith.muli %5, %c32_i32 : i32
    %c32_i32_2 = arith.constant 32 : i32
    %7 = arith.cmpi sle, %6, %c32_i32_2 : i32
    %8 = arith.extui %7 : i1 to i32
    %c0_i32_3 = arith.constant 0 : i32
    %9 = arith.cmpi ne, %8, %c0_i32_3 : i32
    scf.if %9 {
      %c0 = arith.constant 0 : index
      %c0_7 = arith.constant 0 : index
      %16 = vector.load %arg2[%c0, %c0_7] : memref<32x128xf32, #tpu.memory_space<vmem>>, vector<32x128xf32>
      %c0_8 = arith.constant 0 : index
      %c0_9 = arith.constant 0 : index
      %17 = vector.load %arg3[%c0_8, %c0_9] : memref<32x128xi8, #tpu.memory_space<vmem>>, vector<32x128xi8>
      %18 = arith.sitofp %17 : vector<32x128xi8> to vector<32x128xf32>
      %c0_10 = arith.constant 0 : index
      %c0_11 = arith.constant 0 : index
      %19 = vector.load %arg6[%c0_10, %c0_11] : memref<8x128xf32, #tpu.memory_space<vmem>>, vector<8x128xf32>
      %20 = math.log %16 : vector<32x128xf32>
      %21 = arith.mulf %18, %20 : vector<32x128xf32>
      %22 = vector.shape_cast %21 : vector<32x128xf32> to vector<4x8x128xf32>
      %cst = arith.constant dense<0.000000e+00> : vector<8x128xf32>
      %23 = vector.multi_reduction <add>, %22, %cst [0] : vector<4x8x128xf32> to vector<8x128xf32>
      %24 = arith.addf %19, %23 : vector<8x128xf32>
      %c0_12 = arith.constant 0 : index
      %c0_13 = arith.constant 0 : index
      %25 = vector.load %arg6[%c0_12, %c0_13] : memref<8x128xf32, #tpu.memory_space<vmem>>, vector<8x128xf32>
      tpu.vector_store %arg6[%c0_12, %c0_13], %24 {strides = array<i32>} : memref<8x128xf32, #tpu.memory_space<vmem>>, vector<8x128xf32>,
      %c0_14 = arith.constant 0 : index
      %c0_15 = arith.constant 0 : index
      %26 = vector.load %arg7[%c0_14, %c0_15] : memref<8x128xf32, #tpu.memory_space<vmem>>, vector<8x128xf32>
      %27 = vector.shape_cast %18 : vector<32x128xf32> to vector<4x8x128xf32>
      %cst_16 = arith.constant dense<0.000000e+00> : vector<8x128xf32>
      %28 = vector.multi_reduction <add>, %27, %cst_16 [0] : vector<4x8x128xf32> to vector<8x128xf32>
      %29 = arith.addf %26, %28 : vector<8x128xf32>
      %c0_17 = arith.constant 0 : index
      %c0_18 = arith.constant 0 : index
      %30 = vector.load %arg7[%c0_17, %c0_18] : memref<8x128xf32, #tpu.memory_space<vmem>>, vector<8x128xf32>
      tpu.vector_store %arg7[%c0_17, %c0_18], %29 {strides = array<i32>} : memref<8x128xf32, #tpu.memory_space<vmem>>, vector<8x128xf32>,
    } else {
    }
    %true = arith.constant true
    %10 = arith.xori %7, %true : i1
    %11 = arith.extui %10 : i1 to i32
    %c0_i32_4 = arith.constant 0 : i32
    %12 = arith.cmpi ne, %11, %c0_i32_4 : i32
    scf.if %12 {
      %16 = tpu.iota {dimensions = array<i32: 0>} : vector<32x128xi32>
      %c32_i32_7 = arith.constant 32 : i32
      %17 = arith.muli %4, %c32_i32_7 : i32
      %18 = vector.broadcast %17 : i32 to vector<32x128xi32>
      %19 = arith.addi %18, %16 : vector<32x128xi32>
      %c32_i32_8 = arith.constant 32 : i32
      %20 = vector.broadcast %c32_i32_8 : i32 to vector<32x128xi32>
      %21 = arith.cmpi slt, %19, %20 : vector<32x128xi32>
      %c0 = arith.constant 0 : index
      %c0_9 = arith.constant 0 : index
      %22 = vector.load %arg2[%c0, %c0_9] : memref<32x128xf32, #tpu.memory_space<vmem>>, vector<32x128xf32>
      %cst = arith.constant 1.000000e+00 : f32
      %23 = vector.broadcast %cst : f32 to vector<32x128xf32>
      %24 = arith.select %21, %22, %23 : vector<32x128xi1>, vector<32x128xf32>
      %c0_10 = arith.constant 0 : index
      %c0_11 = arith.constant 0 : index
      %25 = vector.load %arg3[%c0_10, %c0_11] : memref<32x128xi8, #tpu.memory_space<vmem>>, vector<32x128xi8>
      %26 = arith.sitofp %25 : vector<32x128xi8> to vector<32x128xf32>
      %cst_12 = arith.constant 0.000000e+00 : f32
      %27 = vector.broadcast %cst_12 : f32 to vector<32x128xf32>
      %28 = arith.select %21, %26, %27 : vector<32x128xi1>, vector<32x128xf32>
      %c0_13 = arith.constant 0 : index
      %c0_14 = arith.constant 0 : index
      %29 = vector.load %arg6[%c0_13, %c0_14] : memref<8x128xf32, #tpu.memory_space<vmem>>, vector<8x128xf32>
      %30 = math.log %24 : vector<32x128xf32>
      %31 = arith.mulf %28, %30 : vector<32x128xf32>
      %32 = vector.shape_cast %31 : vector<32x128xf32> to vector<4x8x128xf32>
      %cst_15 = arith.constant dense<0.000000e+00> : vector<8x128xf32>
      %33 = vector.multi_reduction <add>, %32, %cst_15 [0] : vector<4x8x128xf32> to vector<8x128xf32>
      %34 = arith.addf %29, %33 : vector<8x128xf32>
      %c0_16 = arith.constant 0 : index
      %c0_17 = arith.constant 0 : index
      %35 = vector.load %arg6[%c0_16, %c0_17] : memref<8x128xf32, #tpu.memory_space<vmem>>, vector<8x128xf32>
      tpu.vector_store %arg6[%c0_16, %c0_17], %34 {strides = array<i32>} : memref<8x128xf32, #tpu.memory_space<vmem>>, vector<8x128xf32>,
      %c0_18 = arith.constant 0 : index
      %c0_19 = arith.constant 0 : index
      %36 = vector.load %arg7[%c0_18, %c0_19] : memref<8x128xf32, #tpu.memory_space<vmem>>, vector<8x128xf32>
      %37 = vector.shape_cast %28 : vector<32x128xf32> to vector<4x8x128xf32>
      %cst_20 = arith.constant dense<0.000000e+00> : vector<8x128xf32>
      %38 = vector.multi_reduction <add>, %37, %cst_20 [0] : vector<4x8x128xf32> to vector<8x128xf32>
      %39 = arith.addf %36, %38 : vector<8x128xf32>
      %c0_21 = arith.constant 0 : index
      %c0_22 = arith.constant 0 : index
      %40 = vector.load %arg7[%c0_21, %c0_22] : memref<8x128xf32, #tpu.memory_space<vmem>>, vector<8x128xf32>
      tpu.vector_store %arg7[%c0_21, %c0_22], %39 {strides = array<i32>} : memref<8x128xf32, #tpu.memory_space<vmem>>, vector<8x128xf32>,
    } else {
    }
    %c0_i32_5 = arith.constant 0 : i32
    %13 = arith.cmpi eq, %arg1, %c0_i32_5 : i32
    %14 = arith.extui %13 : i1 to i32
    %c0_i32_6 = arith.constant 0 : i32
    %15 = arith.cmpi ne, %14, %c0_i32_6 : i32
    scf.if %15 {
      %c0 = arith.constant 0 : index
      %c0_7 = arith.constant 0 : index
      %16 = vector.load %arg6[%c0, %c0_7] : memref<8x128xf32, #tpu.memory_space<vmem>>, vector<8x128xf32>
      %17 = vector.shape_cast %16 : vector<8x128xf32> to vector<1x8x128xf32>
      %cst = arith.constant dense<0.000000e+00> : vector<1xf32>
      %18 = vector.multi_reduction <add>, %17, %cst [1, 2] : vector<1x8x128xf32> to vector<1xf32>
      %19 = vector.shape_cast %18 : vector<1xf32> to vector<1x1x1xf32>
      %20 = vector.extract %19[0, 0, 0] : f32 from vector<1x1x1xf32>
      %21 = vector.broadcast %20 : f32 to vector<1x1x1xf32>
      %c0_8 = arith.constant 0 : index
      %c0_9 = arith.constant 0 : index
      %c0_10 = arith.constant 0 : index
      %22 = vector.load %arg4[%c0_8, %c0_9, %c0_10] : memref<1x1x1xf32, #tpu.memory_space<vmem>>, vector<1x1x1xf32>
      tpu.vector_store %arg4[%c0_8, %c0_9, %c0_10], %21 {strides = array<i32>} : memref<1x1x1xf32, #tpu.memory_space<vmem>>, vector<1x1x1xf32>,
      %c0_11 = arith.constant 0 : index
      %c0_12 = arith.constant 0 : index
      %23 = vector.load %arg7[%c0_11, %c0_12] : memref<8x128xf32, #tpu.memory_space<vmem>>, vector<8x128xf32>
      %24 = vector.shape_cast %23 : vector<8x128xf32> to vector<1x8x128xf32>
      %cst_13 = arith.constant dense<0.000000e+00> : vector<1xf32>
      %25 = vector.multi_reduction <add>, %24, %cst_13 [1, 2] : vector<1x8x128xf32> to vector<1xf32>
      %26 = vector.shape_cast %25 : vector<1xf32> to vector<1x1x1xf32>
      %27 = vector.extract %26[0, 0, 0] : f32 from vector<1x1x1xf32>
      %28 = vector.broadcast %27 : f32 to vector<1x1x1xf32>
      %c0_14 = arith.constant 0 : index
      %c0_15 = arith.constant 0 : index
      %c0_16 = arith.constant 0 : index
      %29 = vector.load %arg5[%c0_14, %c0_15, %c0_16] : memref<1x1x1xf32, #tpu.memory_space<vmem>>, vector<1x1x1xf32>
      tpu.vector_store %arg5[%c0_14, %c0_15, %c0_16], %28 {strides = array<i32>} : memref<1x1x1xf32, #tpu.memory_space<vmem>>, vector<1x1x1xf32>,
    } else {
    }
    return
  }
  func.func @transform_0(%arg0: i32, %arg1: i32) -> (i32, i32) {
    %c1_i32 = arith.constant 1 : i32
    %0 = arith.muli %arg0, %c1_i32 : i32
    %1 = arith.addi %0, %arg1 : i32
    %c0_i32 = arith.constant 0 : i32
    %2 = arith.minsi %1, %c0_i32 : i32
    %c0_i32_0 = arith.constant 0 : i32
    %c0_i32_1 = arith.constant 0 : i32
    return %2, %c0_i32_0 : i32, i32
  }
  func.func @transform_1(%arg0: i32, %arg1: i32) -> (i32, i32) {
    %c1_i32 = arith.constant 1 : i32
    %0 = arith.muli %arg0, %c1_i32 : i32
    %1 = arith.addi %0, %arg1 : i32
    %c0_i32 = arith.constant 0 : i32
    %2 = arith.minsi %1, %c0_i32 : i32
    %c0_i32_0 = arith.constant 0 : i32
    %c0_i32_1 = arith.constant 0 : i32
    return %2, %c0_i32_0 : i32, i32
  }
  func.func @transform_2(%arg0: i32, %arg1: i32) -> (i32, i32, i32) {
    %c0_i32 = arith.constant 0 : i32
    %c0_i32_0 = arith.constant 0 : i32
    %c0_i32_1 = arith.constant 0 : i32
    return %arg0, %c0_i32, %c0_i32_0 : i32, i32, i32
  }
  func.func @transform_3(%arg0: i32, %arg1: i32) -> (i32, i32, i32) {
    %c0_i32 = arith.constant 0 : i32
    %c0_i32_0 = arith.constant 0 : i32
    %c0_i32_1 = arith.constant 0 : i32
    return %arg0, %c0_i32, %c0_i32_0 : i32, i32, i32
  }
}

</mosaic_0001>

<bundles_post_ra>
// kernel: tpu_custom_call.1
= control target key start
LH: loop header
LB: loop body
LE: loop exit
PB: predicated region body
PF: predicated region fallthrough
CT: control target
= control target key end

     0   :  { %9 = vsyncpa [#allocation5], 0  ;;  %s926_s0 = inlined_call_operand.hbm [shape: f32[32,128], index: 0, kind: input, shape index: {}]   ;;  %s927_s1 = inlined_call_operand.hbm [shape: s8[32,128], index: 1, kind: input, shape index: {}]   ;;  %s928_s2 = inlined_call_operand.vmem [shape: f32[2,1,1], index: 2, kind: output, shape index: {0}]   ;;  %s929_s3 = inlined_call_operand.vmem [shape: f32[2,1,1], index: 3, kind: output, shape index: {1}]  }
   0x1   :  { %11 = vsyncpa [#allocation5 + $0x1], 0 }
   0x2   :  { %12 = vsyncpa [#allocation7], 0 }
   0x3   :  { %14 = vsyncpa [#allocation7 + $0x1], 0  ;;  %s769_s12 = smov 0   ;;  %s771_s13 = smov 0  }
   0x4   :  { %s773_s14 = smov 0   ;;  %s775_s15 = smov 0  }
   0x5   :  { %s777_s16 = smov 0  }
   0x6 LB: > { %s527_s17 = sadd.s32 4294967295, %s742_s16   ;;  %s32_s18 = sadd.s32 1, %s738_s15  ;;  %s742_s16 = sphi %s777_s16, %s20_s16   ;;  %s738_s15 = sphi %s775_s15, %s938_s15   ;;  %s734_s14 = sphi %s773_s14, %s937_s14   ;;  %s730_s13 = sphi %s771_s13, %s916_s13   ;;  %s726_s12 = sphi %s769_s12, %s936_s12  }
   0x7   : > { %p34_p0 = scmp.ge.s32.totalorder %s32_s18, 2  ;;  %p723_p1 = scmp.ne.s32.totalorder %s730_s13, 0 }
   0x8   : > { %p53_p2 = scmp.eq.s32.totalorder %s742_s16, 0  ;;  %p58_p3 = scmp.ne.s32.totalorder %s730_s13, %s726_s12 }
   0x9   : > { %s940_s18 = smov (%p34_p0, %s32_s18), 0  ;;  %p59_p4 = scmp.eq.s32.totalorder %s527_s17, 0 }
   0xa   : > { %p54_p5 = por %p723_p1, %p53_p2  ;;  %p563_p7 = scmp.lt.s32.totalorder %s742_s16, 2 }
   0xb   : > { %p799_p6 = por %p59_p4, %p58_p3  ;;  %s744_s20 = smov [#allocation4]  }
   0xc   : > { %s180_s21 = sshll.u32 %s744_s20, 4  ;;  %p804_p8 = pnand %p563_p7, %p54_p5  ;;  %s181_s21 = int_to_ptr.vmem [resolvable:$true] %s180_s21 }
   0xd   : > { %s931_s19 = scalar_select %p799_p6, 1, 0 }
   0xe   : > { %s631_s25 = scalar_lea.hbm %s926_s0, 512  ;;  %p633_p10 = pneg %p804_p8 }
   0xf   : > { %p632_p9 = scmp.ne.s32.totalorder %s926_s0, %s631_s25  ;;  %p638_p13 = scmp.lt.u32.totalorder %s631_s25, %s631_s25 }
  0x10   : > { %p640_p0 = scmp.lt.u32.totalorder %s631_s25, %s926_s0 }
  0x11   : > { %p634_p11 = pnand %p633_p10, %p632_p9 }
  0x12   : > { %p641_p1 = por %p640_p0, %p638_p13 }
  0x13   : > { %p635_p12 = pneg %p634_p11 }
  0x15   : > { %p642_p2 = pnand %p641_p1, %p635_p12 }
  0x17   : > { %645 = shalt.err (!%p642_p2)
}
  0x18   : > { %s646_s30 = scalar_lea.vmem %s181_s21, 512  ;;  %s653_s4 = scalar_lea.vmem %s181_s21, 1024 }
  0x19   : > { %p647_p3 = scmp.ne.s32.totalorder %s181_s21, %s646_s30  ;;  %p654_p7 = scmp.lt.s32.totalorder %s181_s21, %s181_s21 }
  0x1a   : > { %p655_p6 = scmp.lt.s32.totalorder %s653_s4, %s646_s30 }
  0x1b   : > { %p649_p4 = pnand %p647_p3, %p633_p10 }
  0x1c   : > { %p656_p9 = por %p655_p6, %p654_p7 }
  0x1d   : > { %p650_p5 = pneg %p649_p4 }
  0x1f   : > { %p657_p11 = pnand %p656_p9, %p650_p5 }
  0x21   : > { %660 = shalt.err (!%p657_p11)
}
  0x22   : > { %s745_s5 = smov 128   ;;  %s746_s6 = smov 8  }
  0x23   : > { %559 = dma.hbm_to_vmem [thread:$0]  (!%p804_p8), %s926_s0, 512, %s181_s21, [#allocation5], %s745_s5, %s745_s5, %s746_s6  }
  0x24   : > { %p536_p12 = scmp.ge.s32.totalorder %s742_s16, 1  ;;  %p209_p13 = scmp.lt.s32.totalorder %s742_s16, 3 }
  0x25   : > { %s747_s10 = smov [#allocation6]   ;;  %s661_s20 = scalar_lea.hbm %s927_s1, 128 }
  0x26   : > { %p832_p0 = pnand %p536_p12, %p209_p13  ;;  %s204_s11 = sshll.u32 %s747_s10, 4  ;;  %s205_s11 = int_to_ptr.vmem [resolvable:$true] %s204_s11 }
  0x27   : > { %p662_p6 = scmp.ne.s32.totalorder %s927_s1, %s661_s20  ;;  %p668_p3 = scmp.lt.u32.totalorder %s661_s20, %s661_s20 }
  0x28   : > { %s933_s9 = scalar_select %p832_p0, 1, 0 }
  0x29   : > { %p664_p1 = pnand %p662_p6, %p633_p10  ;;  %p670_p4 = scmp.lt.u32.totalorder %s661_s20, %s927_s1 }
  0x2b   : > { %p665_p2 = pneg %p664_p1  ;;  %p671_p5 = por %p670_p4, %p668_p3 }
  0x2d   : > { %p672_p7 = pnand %p671_p5, %p665_p2 }
  0x2f   : > { %675 = shalt.err (!%p672_p7)
}
  0x30   : > { %s676_s26 = scalar_lea.vmem %s205_s11, 128  ;;  %s683_s27 = scalar_lea.vmem %s205_s11, 256 }
  0x31   : > { %p677_p9 = scmp.ne.s32.totalorder %s205_s11, %s676_s26  ;;  %p684_p13 = scmp.lt.s32.totalorder %s205_s11, %s205_s11 }
  0x32   : > { %p685_p0 = scmp.lt.s32.totalorder %s683_s27, %s676_s26 }
  0x33   : > { %p679_p11 = pnand %p677_p9, %p633_p10 }
  0x34   : > { %p686_p6 = por %p685_p0, %p684_p13 }
  0x35   : > { %p680_p12 = pneg %p679_p11 }
  0x37   : > { %p687_p1 = pnand %p686_p6, %p680_p12 }
  0x39   : > { %690 = shalt.err (!%p687_p1)
}
  0x3a   : > { %562 = dma.hbm_to_vmem [thread:$0]  (!%p804_p8), %s927_s1, 128, %s205_s11, [#allocation7]  }
  0x3b   : > { %p934_p2 = scmp.ne.s32.totalorder %s933_s9, 0 }
  0x3c   : > { %s215_s30 = sand.u32 (!%p934_p2), 1, %s730_s13   ;;  %p935_p10 = scmp.ne.s32.totalorder (!%p934_p2), %s931_s19, 0 }
  0x3d   : > { %213 = sbr.rel (%p934_p2) target bundleno = 354 (0x162), region = 28  ;;  %s537_s4 = sshll.u32 (!%p934_p2), %s215_s30, 5 }
  0x3e   : > { %s216_s5 = scalar_lea.sflag (!%p934_p2), [#allocation5], %s215_s30  ;;  %s859_s6 = scalar_lea.vmem (!%p934_p2), [#allocation4], %s537_s4 }
  0x44   : > { %716 = dma.done.wait (%p935_p10), %s216_s5, 512  }
  0x45   : > { %718 = vsyncadd (%p935_p10), %s216_s5, 4294966784  ;;  %s538_s22 = sshll.u32 %s215_s30, 3  ;;  %s225_s7 = scalar_lea.sflag [#allocation7], %s215_s30 }
  0x46   : > { %s865_s8 = scalar_lea.vmem [#allocation6], %s538_s22 }
  0x47   : > { %720 = dma.done.wait (%p935_p10), %s225_s7, 128  }
  0x48   : > { %722 = vsyncadd (%p935_p10), %s225_s7, 4294967168  ;;  %p264_p8 = scmp.lt.s32.totalorder %s734_s14, 1  ;;  %s546_s9 = sshll.u32 %s734_s14, 5  ;;  %v748_v0 = vmov 0.0  }
  0x49   : > { %274 = vst [vmem:[#allocation2] sm:$0xff] %v748_v0  ;;  %275 = vst [vmem:[#allocation3] sm:$0xff] %v748_v0  ;;  %s875_s10 = sadd.s32 32, %s546_s9 }
  0x4a   : > { %s878_s11 = scalar_select %p264_p8, %s734_s14, 1 }
  0x4b   : > { %p540_p0 = scmp.gt.s32.totalorder %s875_s10, 32 }
  0x4c   : > { %s266_s19 = scalar_lea.vmem %s928_s2, %s878_s11  ;;  %s269_s24 = scalar_lea.vmem %s929_s3, %s878_s11  ;;  %v283_v1 = vld [vmem:[%s859_s6] sm:$0xff] (!%p540_p0)  ;;  %v284_v2 = vld [vmem:[%s859_s6 + $0x8] sm:$0xff] (!%p540_p0)  ;;  %v285_v4 = vld [vmem:[%s859_s6 + $0x10] sm:$0xff] (!%p540_p0) }
  0x4d   : > { %282 = sbr.rel (%p540_p0) target bundleno = 102 (0x66), region = 44  ;;  %v287_v3 = vld [vmem:[%s865_s8] sm:$0xff] (!%p540_p0)  ;;  %615 = vlog2.f32 (!%p540_p0), %v283_v1  ;;  %v286_v8 = vld [vmem:[%s859_s6 + $0x18] sm:$0xff] (!%p540_p0) }
  0x4e   : > { %v288_v5 = vunpack.c.0.s8 (!%p540_p0), %v287_v3  ;;  %v289_v6 = vunpack.c.1.s8 (!%p540_p0), %v287_v3  ;;  %v290_v7 = vunpack.c.2.s8 (!%p540_p0), %v287_v3  ;;  %617 = vlog2.f32 (!%p540_p0), %v284_v2 }
  0x4f   : > { %v291_v9 = vunpack.c.3.s8 (!%p540_p0), %v287_v3  ;;  %619 = vlog2.f32 (!%p540_p0), %v285_v4 }
  0x50   : > { %v292_v10 = vcvt.s32.f32 (!%p540_p0), %v288_v5  ;;  %v293_v11 = vcvt.s32.f32 (!%p540_p0), %v289_v6  ;;  %v294_v12 = vcvt.s32.f32 (!%p540_p0), %v290_v7  ;;  %621 = vlog2.f32 (!%p540_p0), %v286_v8  ;;  %v314_v16 = vld [vmem:[#allocation3] sm:$0xff] (!%p540_p0)  ;;  %v296_v33 = vld [vmem:[#allocation2] sm:$0xff] (!%p540_p0) }
  0x51   : > { %v295_v14 = vcvt.s32.f32 (!%p540_p0), %v291_v9 }
  0x52   : > { %v315_v13 = vadd.f32 (!%p540_p0), %v293_v11, %v292_v10 }
  0x54   : > { %v316_v15 = vadd.f32 %v315_v13, %v294_v12 }
  0x56   : > { %v317_v17 = vadd.f32 %v316_v15, %v295_v14 }
  0x57   : > { %v616_v18 = vpop.eup %615 }
  0x58   : > { %v298_v19 = vmul.f32 0.6931472, %v616_v18  ;;  %v318_v20 = vadd.f32 %v317_v17, %v314_v16  ;;  %v618_v21 = vpop.eup %617 }
  0x59   : > { %v300_v22 = vmul.f32 0.6931472, %v618_v21  ;;  %v620_v24 = vpop.eup %619 }
  0x5a   : > { %v305_v23 = vmul.f32 %v298_v19, %v292_v10  ;;  %319 = vst [vmem:[#allocation3] sm:$0xff] %v318_v20  ;;  %v622_v25 = vpop.eup %621  ;;  %v302_v26 = vmul.f32 0.6931472, %v620_v24 }
  0x5b   : > { %v306_v27 = vmul.f32 %v300_v22, %v293_v11  ;;  %v304_v28 = vmul.f32 0.6931472, %v622_v25 }
  0x5c   : > { %v307_v29 = vmul.f32 %v302_v26, %v294_v12 }
  0x5d   : > { %v309_v30 = vadd.f32 %v306_v27, %v305_v23  ;;  %v308_v31 = vmul.f32 %v304_v28, %v295_v14 }
  0x5f   : > { %v310_v32 = vadd.f32 %v309_v30, %v307_v29 }
  0x61   : > { %v311_v34 = vadd.f32 %v310_v32, %v308_v31 }
  0x63   : > { %v312_v35 = vadd.f32 %v311_v34, %v296_v33 }
  0x65   : > { %313 = vst [vmem:[#allocation2] sm:$0xff] %v312_v35 }
  0x66 PF: > { %p541_p3 = scmp.le.s32.totalorder %s875_s10, 32 }
  0x67   : > { %v324_v36 = vlaneseq (!%p541_p3)  ;;  %v330_v37 = vstv (!%p541_p3), %s546_s9  ;;  %v347_v38 = vld [vmem:[%s865_s8] sm:$0xff] (!%p541_p3)  ;;  %v341_v55 = vld [vmem:[%s859_s6 + $0x10] sm:$0xff] (!%p541_p3)  ;;  %v342_v56 = vld [vmem:[%s859_s6 + $0x18] sm:$0xff] (!%p541_p3) }
  0x68   : > { %323 = sbr.rel (%p541_p3) target bundleno = 137 (0x89), region = 48  ;;  %v348_v40 = vunpack.c.0.s8 (!%p541_p3), %v347_v38  ;;  %v349_v41 = vunpack.c.1.s8 (!%p541_p3), %v347_v38  ;;  %v350_v42 = vunpack.c.2.s8 (!%p541_p3), %v347_v38  ;;  %v351_v43 = vunpack.c.3.s8 (!%p541_p3), %v347_v38  ;;  %v339_v48 = vld [vmem:[%s859_s6] sm:$0xff] (!%p541_p3)  ;;  %v340_v54 = vld [vmem:[%s859_s6 + $0x8] sm:$0xff] (!%p541_p3)  ;;  %v378_v5 = vld [vmem:[#allocation3] sm:$0xff] (!%p541_p3) }
  0x69   : > { %v325_v39 = vshrl.u32 (!%p541_p3), %v324_v36, 7 }
  0x6a   : > { %v352_v49 = vcvt.s32.f32 (!%p541_p3), %v348_v40  ;;  %v353_v50 = vcvt.s32.f32 (!%p541_p3), %v349_v41  ;;  %v354_v58 = vcvt.s32.f32 (!%p541_p3), %v350_v42  ;;  %v355_v59 = vcvt.s32.f32 (!%p541_p3), %v351_v43 }
  0x6b   : > { %v326_v44 = vadd.s32 (!%p541_p3), 8, %v325_v39  ;;  %v327_v45 = vadd.s32 (!%p541_p3), 16, %v325_v39  ;;  %v328_v46 = vadd.s32 (!%p541_p3), 24, %v325_v39  ;;  %v331_v47 = vadd.s32 (!%p541_p3), %v330_v37, %v325_v39 }
  0x6c   : > { %v360_v22 = vld [vmem:[#allocation2] sm:$0xff] (!%p541_p3) }
  0x6d   : > { %v332_v51 = vadd.s32 (!%p541_p3), %v330_v37, %v326_v44  ;;  %v333_v52 = vadd.s32 (!%p541_p3), %v330_v37, %v327_v45  ;;  %v334_v53 = vadd.s32 (!%p541_p3), %v330_v37, %v328_v46  ;;  %vm335_vm0 = vcmp.lt.s32.totalorder (!%p541_p3), %v331_v47, 32 }
  0x6e   : > { %v343_v57 = vsel (!%p541_p3), %vm335_vm0, %v339_v48, 1.0  ;;  %v356_v60 = vsel (!%p541_p3), %vm335_vm0, %v352_v49, 0.0 }
  0x6f   : > { %vm336_vm1 = vcmp.lt.s32.totalorder %v332_v51, 32  ;;  %vm337_vm2 = vcmp.lt.s32.totalorder %v333_v52, 32  ;;  %vm338_vm3 = vcmp.lt.s32.totalorder %v334_v53, 32  ;;  %623 = vlog2.f32 %v343_v57 }
  0x70   : > { %v344_v61 = vsel %vm336_vm1, %v340_v54, 1.0  ;;  %v345_v62 = vsel %vm337_vm2, %v341_v55, 1.0  ;;  %v346_v63 = vsel %vm338_vm3, %v342_v56, 1.0  ;;  %v357_v0 = vsel %vm336_vm1, %v353_v50, 0.0 }
  0x71   : > { %625 = vlog2.f32 %v344_v61  ;;  %v379_v1 = vadd.f32 %v357_v0, %v356_v60  ;;  %v358_v2 = vsel %vm337_vm2, %v354_v58, 0.0  ;;  %v359_v4 = vsel %vm338_vm3, %v355_v59, 0.0 }
  0x72   : > { %627 = vlog2.f32 %v345_v62 }
  0x73   : > { %629 = vlog2.f32 %v346_v63  ;;  %v380_v3 = vadd.f32 %v379_v1, %v358_v2 }
  0x75   : > { %v381_v6 = vadd.f32 %v380_v3, %v359_v4 }
  0x77   : > { %v382_v7 = vadd.f32 %v381_v6, %v378_v5 }
  0x79   : > { %v624_v8 = vpop.eup %623  ;;  %383 = vst [vmem:[#allocation3] sm:$0xff] %v382_v7 }
  0x7a   : > { %v362_v9 = vmul.f32 0.6931472, %v624_v8 }
  0x7b   : > { %v626_v10 = vpop.eup %625 }
  0x7c   : > { %v628_v11 = vpop.eup %627  ;;  %v364_v12 = vmul.f32 0.6931472, %v626_v10  ;;  %v369_v13 = vmul.f32 %v362_v9, %v356_v60 }
  0x7d   : > { %v630_v14 = vpop.eup %629  ;;  %v366_v15 = vmul.f32 0.6931472, %v628_v11 }
  0x7e   : > { %v368_v16 = vmul.f32 0.6931472, %v630_v14  ;;  %v370_v17 = vmul.f32 %v364_v12, %v357_v0 }
  0x7f   : > { %v371_v18 = vmul.f32 %v366_v15, %v358_v2 }
  0x80   : > { %v372_v19 = vmul.f32 %v368_v16, %v359_v4  ;;  %v373_v20 = vadd.f32 %v370_v17, %v369_v13 }
  0x82   : > { %v374_v21 = vadd.f32 %v373_v20, %v371_v18 }
  0x84   : > { %v375_v23 = vadd.f32 %v374_v21, %v372_v19 }
  0x86   : > { %v376_v24 = vadd.f32 %v375_v23, %v360_v22 }
  0x88   : > { %377 = vst [vmem:[#allocation2] sm:$0xff] %v376_v24 }
  0x89 PF: > { %v400_v26 = vld [vmem:[#allocation3] sm:$0xff]  ;;  %vm398_vm4 = vcmask 0  }
  0x8f   : > { %v387_v25 = vld [vmem:[#allocation2] sm:$0xff] }
  0x90   : > { %388 = vadd.xlane.f32.xlu0 %v387_v25 }
  0x94   : > { %401 = vadd.xlane.f32.xlu0 %v400_v26 }
 0x11d   : > { %v389_v27 = vpop.xlane.xlu0 %388 }
 0x11e   : > { %v390_v28 = vrot.slane %v389_v27, 4 }
 0x120   : > { %v391_v29 = vadd.f32 %v390_v28, %v389_v27 }
 0x121   : > { %v402_v30 = vpop.xlane.xlu0 %401 }
 0x122   : > { %v392_v31 = vrot.slane %v391_v29, 2  ;;  %v403_v32 = vrot.slane %v402_v30, 4 }
 0x124   : > { %v404_v33 = vadd.f32 %v403_v32, %v402_v30  ;;  %v393_v34 = vadd.f32 %v392_v31, %v391_v29 }
 0x126   : > { %v405_v35 = vrot.slane %v404_v33, 2  ;;  %v394_v36 = vrot.slane %v393_v34, 1 }
 0x128   : > { %v406_v37 = vadd.f32 %v405_v35, %v404_v33  ;;  %v395_v38 = vadd.f32 %v394_v36, %v393_v34 }
 0x12a   : > { %548 = vpush %v395_v38  ;;  %v407_v39 = vrot.slane %v406_v37, 1 }
 0x12c   : > { %v408_v40 = vadd.f32 %v407_v39, %v406_v37 }
 0x12e   : > { %550 = vpush %v408_v40 }
 0x15b   : > { %s549_s14 = spop %548 }
 0x15c   : > { %v397_v41 = vstv %s549_s14 }
 0x15d   : > { %399 = vst.msk [vmem:[%s266_s19] sm:$0x1] %vm398_vm4, %v397_v41 }
 0x15f   : > { %s551_s26 = spop %550 }
 0x160   : > { %v410_v42 = vstv %s551_s26 }
 0x161   : > { %411 = vst.msk [vmem:[%s269_s24] sm:$0x1] %vm398_vm4, %v410_v42 }
 0x162 PF: > { %s20_s16 = sadd.s32 1, %s742_s16   ;;  %s936_s12 = smov %s730_s13 }
 0x163   : > { %p17_p4 = scmp.ge.s32.totalorder %s20_s16, 4   ;;  %s916_s13 = smov 0  }
 0x164   : > { %s937_s14 = smov %s738_s15  ;;  %s938_s15 = smov %s940_s18 }
 0x165   :  { %19 = sbr.rel (!%p17_p4) target bundleno = 6 (0x6), region = 109 }
 0x16c   :  { %441 = vsyncpa [#allocation5], 1 }
 0x16d   :  { %443 = vsyncpa [#allocation5 + $0x1], 1 }
 0x16e   :  { %444 = vsyncpa [#allocation7], 1 }
 0x16f   :  { %446 = vsyncpa [#allocation7 + $0x1], 1 }

</bundles_post_ra>
